<compile_context>
chip_gen: v7x
topology: tpu7x:2x2x1
jax: 0.10.0
libtpu: 0.0.40
codegen_flags: <defaults>
</compile_context>

<pallas_src>
import functools

import jax
import jax.numpy as jnp
from jax.experimental import pallas as pl
from jax.experimental.pallas import tpu as pltpu

_LANE = 128      # last-dim (lane) granularity
_SUBLANE = 8     # second-to-last-dim (sublane) granularity for f32


def _round_up(x, m):
    return ((x + m - 1) // m) * m


def _pick_batch_tile(batch, max_tile):
    """Pick the batch tile adaptively.

    Prefer the largest power-of-two tile that (a) wastes <~6% rows to padding, (b) leaves
    >= 2 grid steps (v7x megacore: the 'parallel' batch axis is what shards work across the
    2 TensorCores) and (c) keeps >= 128 rows per step (v6e MXU push amortization).
    Fall back to the minimal 8-row tile for tiny batches."""
    batch8 = _round_up(batch, _SUBLANE)
    cap = max(_SUBLANE, min(_round_up(max_tile, _SUBLANE), batch8))
    cands = [c for c in (1024, 512, 256, 128, 64, 32, 16, 8) if c <= cap]

    def waste(c):
        bp = _round_up(batch8, c)
        return (bp - batch) / bp

    for c in cands:
        if waste(c) <= 0.0625 and _round_up(batch8, c) // c >= 2 and c >= 128:
            return c
    for c in cands:
        if waste(c) <= 0.0625:
            return c
    return _SUBLANE


def _fused_mlp_kernel(*refs, n_layers, matmul_dtype):
    """refs = (x_ref, w1, b1, ..., wn, bn, o_ref). Entire MLP chained in VMEM.

    Weights/biases arrive already in the MXU dtype (pre-cast outside the kernel); only the
    f32 intermediate activations are cast back down before each matmul.  Accumulation, bias
    add and ReLU are in f32 on the VPU; one epilogue cast/store."""
    x_ref = refs[0]
    o_ref = refs[-1]
    wb = refs[1:-1]

    h = x_ref[...]                                        # already matmul_dtype (first layer)
    for i in range(n_layers):
        w = wb[2 * i][...]
        b = wb[2 * i + 1][...]                            # (1, N) -> broadcasts over batch
        y = jnp.dot(h.astype(matmul_dtype), w,            # MXU: low-precision operands,
                    preferred_element_type=jnp.float32)   #      f32 accumulation
        y = y + b.astype(jnp.float32)                     # bias add in f32 (VPU)
        if i < n_layers - 1:
            y = jnp.maximum(y, 0.0)                       # ReLU on hidden layers only
        h = y
    o_ref[...] = h.astype(o_ref.dtype)                    # single epilogue store


def init_fully_connected_params(key, input_size, output_size, hidden_layers,
                                dtype=jnp.float32):
    """torch.nn.Linear-style init: U(-1/sqrt(fan_in), 1/sqrt(fan_in)) for W and b."""
    sizes = [input_size] + list(hidden_layers) + [output_size]
    params = []
    for i in range(len(sizes) - 1):
        fan_in, fan_out = sizes[i], sizes[i + 1]
        key, wk, bk = jax.random.split(key, 3)
        bound = 1.0 / jnp.sqrt(jnp.asarray(fan_in, dtype))
        w = jax.random.uniform(wk, (fan_in, fan_out), dtype, -bound, bound)
        b = jax.random.uniform(bk, (1, fan_out), dtype, -bound, bound)
        params.append((w, b))
    return params


def prepare_fully_connected_params(params, matmul_dtype=jnp.bfloat16):
    """Pad weights/biases to lane-dense (multiple-of-128) shapes and cast to the MXU dtype ONCE.

    Call this once and cache the result; do NOT rebuild it per forward call.
    Returns (padded_wb, out_dim) where padded_wb = (w1, b1, w2, b2, ...)."""
    dims = [params[0][0].shape[0]] + [w.shape[1] for w, _ in params]
    dims_p = [_round_up(d, _LANE) for d in dims]
    padded = []
    for i, (w, b) in enumerate(params):
        k, n = w.shape
        kp, np_ = dims_p[i], dims_p[i + 1]
        padded.append(jnp.zeros((kp, np_), matmul_dtype).at[:k, :n].set(w.astype(matmul_dtype)))
        padded.append(jnp.zeros((1, np_), matmul_dtype).at[:, :n].set(b.astype(matmul_dtype)))
    return tuple(padded), dims[-1]


def fully_connected_forward(padded_wb, x, *, out_dim, batch_tile=512,
                            matmul_dtype=jnp.bfloat16, out_dtype=None,
                            single_buffer_weights=True):
    """Fused MLP forward on pre-padded / pre-cast parameters (see prepare_fully_connected_params).
    Pads the activations, runs one pallas_call over a parallel batch grid, slices the result."""
    batch, in_dim = x.shape
    out_dtype = x.dtype if out_dtype is None else out_dtype
    n_layers = len(padded_wb) // 2
    # Padded feature dims are recoverable from the (already padded) weight shapes.
    dims_p = [padded_wb[0].shape[0]] + [padded_wb[2 * i].shape[1] for i in range(n_layers)]

    bt = _pick_batch_tile(batch, batch_tile)
    batch_p = _round_up(batch, bt)

    # Pad + cast the activations once in the wrapper (input DMA happens in matmul_dtype).
    x_p = jnp.zeros((batch_p, dims_p[0]), matmul_dtype).at[:batch, :in_dim].set(
        x.astype(matmul_dtype))

    # Weight/bias specs: constant index_map -> same block every grid step -> stays VMEM
    # resident; single-buffered (never re-fetched) so it doesn't double its VMEM footprint.
    def _wspec(shape):
        if single_buffer_weights:
            return pl.BlockSpec(shape, lambda bi: (0, 0), pipeline_mode=pl.Buffered(1))
        return pl.BlockSpec(shape, lambda bi: (0, 0))

    wb_specs = []
    for i in range(n_layers):
        kp, np_ = dims_p[i], dims_p[i + 1]
        wb_specs.append(_wspec((kp, np_)))
        wb_specs.append(_wspec((1, np_)))

    kernel = functools.partial(_fused_mlp_kernel, n_layers=n_layers,
                               matmul_dtype=matmul_dtype)

    # VMEM budget: single-buffered resident weights + double-buffered in/out tiles
    # + f32 intermediate headroom; raise the scoped limit explicitly (v5e default 16 MiB,
    # v6e/v7x 32 MiB), capped at 64 MiB (v7x physical).
    in_item = jnp.dtype(matmul_dtype).itemsize
    out_item = jnp.dtype(out_dtype).itemsize
    weight_bytes = sum(int(a.size) * a.dtype.itemsize for a in padded_wb)
    io_bytes = 2 * bt * (dims_p[0] * in_item + dims_p[-1] * out_item)
    act_bytes = 2 * bt * max(dims_p) * 4
    vmem_limit = int(1.5 * (weight_bytes + io_bytes + act_bytes)) + (4 << 20)
    vmem_limit = max(min(vmem_limit, 64 << 20), 32 << 20)

    flops = 2 * batch_p * sum(dims_p[i] * dims_p[i + 1] for i in range(n_layers))
    bytes_accessed = (batch_p * dims_p[0] * in_item + weight_bytes
                      + batch_p * dims_p[-1] * out_item)

    out_p = pl.pallas_call(
        kernel,
        out_shape=jax.ShapeDtypeStruct((batch_p, dims_p[-1]), out_dtype),
        grid=(batch_p // bt,),
        in_specs=[pl.BlockSpec((bt, dims_p[0]), lambda bi: (bi, 0))] + wb_specs,
        out_specs=pl.BlockSpec((bt, dims_p[-1]), lambda bi: (bi, 0)),
        compiler_params=pltpu.CompilerParams(
            dimension_semantics=("parallel",),
            vmem_limit_bytes=vmem_limit),
        cost_estimate=pl.CostEstimate(flops=flops, transcendentals=0,
                                      bytes_accessed=bytes_accessed),
    )(x_p, *padded_wb)

    return out_p[:batch, :out_dim]


if __name__ == "__main__":
    # Shapes consistent with the module: FullyConnectedNet(16, 8, [32, 32]), batch=4.
    input_size, output_size, hidden_layers = 16, 8, [32, 32]
    batch = 4

    key = jax.random.PRNGKey(0)
    key, xk = jax.random.split(key)
    x = jax.random.normal(xk, (batch, input_size), dtype=jnp.float32)

    params = init_fully_connected_params(key, input_size, output_size, hidden_layers)

    # Pad + cast weights ONCE, outside the per-call hot path (main perf fix).
    wb_bf16, out_dim = prepare_fully_connected_params(params, matmul_dtype=jnp.bfloat16)
    wb_f32, _ = prepare_fully_connected_params(params, matmul_dtype=jnp.float32)

    # Main (performance) path: bf16 MXU operands, f32 accumulation, single-buffered weights.
    single_buffer = True
    fwd_bf16 = jax.jit(functools.partial(fully_connected_forward, out_dim=out_dim,
                                         matmul_dtype=jnp.bfloat16,
                                         single_buffer_weights=single_buffer))
    try:
        out = jax.block_until_ready(fwd_bf16(wb_bf16, x))
    except Exception:
        # Fallback if this jax/Mosaic build rejects pl.Buffered(1): use default double-buffering.
        single_buffer = False
        fwd_bf16 = jax.jit(functools.partial(fully_connected_forward, out_dim=out_dim,
                                             matmul_dtype=jnp.bfloat16,
                                             single_buffer_weights=False))
        out = jax.block_until_ready(fwd_bf16(wb_bf16, x))

    # Fusion/padding exactness check with f32 operands.  (Note: a default-precision f32 dot on
    # TPU may execute as bf16 MXU passes in BOTH the kernel and the plain-JAX reference, so this
    # validates fusion/padding rather than strict-f32 matmul accuracy.)
    fwd_f32 = jax.jit(functools.partial(fully_connected_forward, out_dim=out_dim,
                                        matmul_dtype=jnp.float32,
                                        single_buffer_weights=single_buffer))
    out_f32 = jax.block_until_ready(fwd_f32(wb_f32, x))

    ref = x
    for i, (w, b) in enumerate(params):
        ref = ref @ w + b
        if i != len(params) - 1:
            ref = jnp.maximum(ref, 0.0)

    assert out.shape == (batch, output_size)
    assert out_f32.shape == (batch, output_size)
    assert jnp.allclose(out_f32, ref, atol=1e-5, rtol=1e-5), \
        float(jnp.max(jnp.abs(out_f32 - ref)))
    # bf16 path: same semantics up to bf16 operand/bias rounding.
    assert jnp.allclose(out, ref, atol=5e-2, rtol=5e-2), \
        float(jnp.max(jnp.abs(out - ref)))

    print("KERNEL_OK")
</pallas_src>

<mosaic_0001>
module attributes {stable_mosaic.version = 11 : i64} {
  func.func @_fused_mlp_kernel(%arg0: i32, %arg1: memref<8x128xbf16, #tpu.memory_space<vmem>>, %arg2: memref<128x128xbf16, #tpu.memory_space<vmem>>, %arg3: memref<1x128xbf16, #tpu.memory_space<vmem>>, %arg4: memref<128x128xbf16, #tpu.memory_space<vmem>>, %arg5: memref<1x128xbf16, #tpu.memory_space<vmem>>, %arg6: memref<128x128xbf16, #tpu.memory_space<vmem>>, %arg7: memref<1x128xbf16, #tpu.memory_space<vmem>>, %arg8: memref<8x128xf32, #tpu.memory_space<vmem>>) attributes {dimension_semantics = [#tpu.dimension_semantics<parallel>], iteration_bounds = array<i64: 1>, scalar_prefetch = 0 : i64, scratch_operands = 0 : i64, tpu.core_type = #tpu.core_type<tc>, window_params = [{transform_indices = @transform_0, window_bounds = array<i64: 8, 128>}, {pipeline_mode = #tpu.pipeline_mode<synchronous>, transform_indices = @transform_1, window_bounds = array<i64: 128, 128>}, {pipeline_mode = #tpu.pipeline_mode<synchronous>, transform_indices = @transform_2, window_bounds = array<i64: 1, 128>}, {pipeline_mode = #tpu.pipeline_mode<synchronous>, transform_indices = @transform_3, window_bounds = array<i64: 128, 128>}, {pipeline_mode = #tpu.pipeline_mode<synchronous>, transform_indices = @transform_4, window_bounds = array<i64: 1, 128>}, {pipeline_mode = #tpu.pipeline_mode<synchronous>, transform_indices = @transform_5, window_bounds = array<i64: 128, 128>}, {pipeline_mode = #tpu.pipeline_mode<synchronous>, transform_indices = @transform_6, window_bounds = array<i64: 1, 128>}, {transform_indices = @transform_7, window_bounds = array<i64: 8, 128>}]} {
    %c0 = arith.constant 0 : index
    %c0_0 = arith.constant 0 : index
    %0 = vector.load %arg1[%c0, %c0_0] : memref<8x128xbf16, #tpu.memory_space<vmem>>, vector<8x128xbf16>
    %c0_1 = arith.constant 0 : index
    %c0_2 = arith.constant 0 : index
    %1 = vector.load %arg2[%c0_1, %c0_2] : memref<128x128xbf16, #tpu.memory_space<vmem>>, vector<128x128xbf16>
    %c0_3 = arith.constant 0 : index
    %c0_4 = arith.constant 0 : index
    %2 = vector.load %arg3[%c0_3, %c0_4] : memref<1x128xbf16, #tpu.memory_space<vmem>>, vector<1x128xbf16>
    %cst = arith.constant dense<0.000000e+00> : vector<8x128xf32>
    %3 = tpu.matmul %0, %1, %cst {dimension_numbers = #tpu.dot_dimension_numbers<[1], [0], [0], [1], [0, 0, 1, 1], [], []>} : vector<8x128xbf16>, vector<128x128xbf16>, vector<8x128xf32> -> vector<8x128xf32>
    %4 = arith.extf %2 : vector<1x128xbf16> to vector<1x128xf32>
    %5 = vector.broadcast %4 : vector<1x128xf32> to vector<8x128xf32>
    %6 = arith.addf %3, %5 : vector<8x128xf32>
    %cst_5 = arith.constant 0.000000e+00 : f32
    %7 = vector.broadcast %cst_5 : f32 to vector<8x128xf32>
    %8 = arith.maximumf %6, %7 : vector<8x128xf32>
    %c0_6 = arith.constant 0 : index
    %c0_7 = arith.constant 0 : index
    %9 = vector.load %arg4[%c0_6, %c0_7] : memref<128x128xbf16, #tpu.memory_space<vmem>>, vector<128x128xbf16>
    %c0_8 = arith.constant 0 : index
    %c0_9 = arith.constant 0 : index
    %10 = vector.load %arg5[%c0_8, %c0_9] : memref<1x128xbf16, #tpu.memory_space<vmem>>, vector<1x128xbf16>
    %11 = arith.truncf %8 : vector<8x128xf32> to vector<8x128xbf16>
    %cst_10 = arith.constant dense<0.000000e+00> : vector<8x128xf32>
    %12 = tpu.matmul %11, %9, %cst_10 {dimension_numbers = #tpu.dot_dimension_numbers<[1], [0], [0], [1], [0, 0, 1, 1], [], []>} : vector<8x128xbf16>, vector<128x128xbf16>, vector<8x128xf32> -> vector<8x128xf32>
    %13 = arith.extf %10 : vector<1x128xbf16> to vector<1x128xf32>
    %14 = vector.broadcast %13 : vector<1x128xf32> to vector<8x128xf32>
    %15 = arith.addf %12, %14 : vector<8x128xf32>
    %cst_11 = arith.constant 0.000000e+00 : f32
    %16 = vector.broadcast %cst_11 : f32 to vector<8x128xf32>
    %17 = arith.maximumf %15, %16 : vector<8x128xf32>
    %c0_12 = arith.constant 0 : index
    %c0_13 = arith.constant 0 : index
    %18 = vector.load %arg6[%c0_12, %c0_13] : memref<128x128xbf16, #tpu.memory_space<vmem>>, vector<128x128xbf16>
    %c0_14 = arith.constant 0 : index
    %c0_15 = arith.constant 0 : index
    %19 = vector.load %arg7[%c0_14, %c0_15] : memref<1x128xbf16, #tpu.memory_space<vmem>>, vector<1x128xbf16>
    %20 = arith.truncf %17 : vector<8x128xf32> to vector<8x128xbf16>
    %cst_16 = arith.constant dense<0.000000e+00> : vector<8x128xf32>
    %21 = tpu.matmul %20, %18, %cst_16 {dimension_numbers = #tpu.dot_dimension_numbers<[1], [0], [0], [1], [0, 0, 1, 1], [], []>} : vector<8x128xbf16>, vector<128x128xbf16>, vector<8x128xf32> -> vector<8x128xf32>
    %22 = arith.extf %19 : vector<1x128xbf16> to vector<1x128xf32>
    %23 = vector.broadcast %22 : vector<1x128xf32> to vector<8x128xf32>
    %24 = arith.addf %21, %23 : vector<8x128xf32>
    %c0_17 = arith.constant 0 : index
    %c0_18 = arith.constant 0 : index
    %25 = vector.load %arg8[%c0_17, %c0_18] : memref<8x128xf32, #tpu.memory_space<vmem>>, vector<8x128xf32>
    tpu.vector_store %arg8[%c0_17, %c0_18], %24 {strides = array<i32>} : memref<8x128xf32, #tpu.memory_space<vmem>>, vector<8x128xf32>,
    return
  }
  func.func @transform_0(%arg0: i32) -> (i32, i32) {
    %c0_i32 = arith.constant 0 : i32
    %c0_i32_0 = arith.constant 0 : i32
    return %arg0, %c0_i32 : i32, i32
  }
  func.func @transform_1(%arg0: i32) -> (i32, i32) {
    %c0_i32 = arith.constant 0 : i32
    %c0_i32_0 = arith.constant 0 : i32
    %c0_i32_1 = arith.constant 0 : i32
    return %c0_i32, %c0_i32_0 : i32, i32
  }
  func.func @transform_2(%arg0: i32) -> (i32, i32) {
    %c0_i32 = arith.constant 0 : i32
    %c0_i32_0 = arith.constant 0 : i32
    %c0_i32_1 = arith.constant 0 : i32
    return %c0_i32, %c0_i32_0 : i32, i32
  }
  func.func @transform_3(%arg0: i32) -> (i32, i32) {
    %c0_i32 = arith.constant 0 : i32
    %c0_i32_0 = arith.constant 0 : i32
    %c0_i32_1 = arith.constant 0 : i32
    return %c0_i32, %c0_i32_0 : i32, i32
  }
  func.func @transform_4(%arg0: i32) -> (i32, i32) {
    %c0_i32 = arith.constant 0 : i32
    %c0_i32_0 = arith.constant 0 : i32
    %c0_i32_1 = arith.constant 0 : i32
    return %c0_i32, %c0_i32_0 : i32, i32
  }
  func.func @transform_5(%arg0: i32) -> (i32, i32) {
    %c0_i32 = arith.constant 0 : i32
    %c0_i32_0 = arith.constant 0 : i32
    %c0_i32_1 = arith.constant 0 : i32
    return %c0_i32, %c0_i32_0 : i32, i32
  }
  func.func @transform_6(%arg0: i32) -> (i32, i32) {
    %c0_i32 = arith.constant 0 : i32
    %c0_i32_0 = arith.constant 0 : i32
    %c0_i32_1 = arith.constant 0 : i32
    return %c0_i32, %c0_i32_0 : i32, i32
  }
  func.func @transform_7(%arg0: i32) -> (i32, i32) {
    %c0_i32 = arith.constant 0 : i32
    %c0_i32_0 = arith.constant 0 : i32
    return %arg0, %c0_i32 : i32, i32
  }
}

module attributes {stable_mosaic.version = 11 : i64} {
  func.func @_fused_mlp_kernel(%arg0: i32, %arg1: memref<8x128xbf16, #tpu.memory_space<vmem>>, %arg2: memref<128x128xbf16, #tpu.memory_space<vmem>>, %arg3: memref<1x128xbf16, #tpu.memory_space<vmem>>, %arg4: memref<128x128xbf16, #tpu.memory_space<vmem>>, %arg5: memref<1x128xbf16, #tpu.memory_space<vmem>>, %arg6: memref<128x128xbf16, #tpu.memory_space<vmem>>, %arg7: memref<1x128xbf16, #tpu.memory_space<vmem>>, %arg8: memref<8x128xf32, #tpu.memory_space<vmem>>) attributes {dimension_semantics = [#tpu.dimension_semantics<parallel>], iteration_bounds = array<i64: 1>, scalar_prefetch = 0 : i64, scratch_operands = 0 : i64, tpu.core_type = #tpu.core_type<tc>, window_params = [{transform_indices = @transform_0, window_bounds = array<i64: 8, 128>}, {pipeline_mode = #tpu.pipeline_mode<synchronous>, transform_indices = @transform_1, window_bounds = array<i64: 128, 128>}, {pipeline_mode = #tpu.pipeline_mode<synchronous>, transform_indices = @transform_2, window_bounds = array<i64: 1, 128>}, {pipeline_mode = #tpu.pipeline_mode<synchronous>, transform_indices = @transform_3, window_bounds = array<i64: 128, 128>}, {pipeline_mode = #tpu.pipeline_mode<synchronous>, transform_indices = @transform_4, window_bounds = array<i64: 1, 128>}, {pipeline_mode = #tpu.pipeline_mode<synchronous>, transform_indices = @transform_5, window_bounds = array<i64: 128, 128>}, {pipeline_mode = #tpu.pipeline_mode<synchronous>, transform_indices = @transform_6, window_bounds = array<i64: 1, 128>}, {transform_indices = @transform_7, window_bounds = array<i64: 8, 128>}]} {
    %c0 = arith.constant 0 : index
    %c0_0 = arith.constant 0 : index
    %0 = vector.load %arg1[%c0, %c0_0] : memref<8x128xbf16, #tpu.memory_space<vmem>>, vector<8x128xbf16>
    %c0_1 = arith.constant 0 : index
    %c0_2 = arith.constant 0 : index
    %1 = vector.load %arg2[%c0_1, %c0_2] : memref<128x128xbf16, #tpu.memory_space<vmem>>, vector<128x128xbf16>
    %c0_3 = arith.constant 0 : index
    %c0_4 = arith.constant 0 : index
    %2 = vector.load %arg3[%c0_3, %c0_4] : memref<1x128xbf16, #tpu.memory_space<vmem>>, vector<1x128xbf16>
    %cst = arith.constant dense<0.000000e+00> : vector<8x128xf32>
    %3 = tpu.matmul %0, %1, %cst {dimension_numbers = #tpu.dot_dimension_numbers<[1], [0], [0], [1], [0, 0, 1, 1], [], []>} : vector<8x128xbf16>, vector<128x128xbf16>, vector<8x128xf32> -> vector<8x128xf32>
    %4 = arith.extf %2 : vector<1x128xbf16> to vector<1x128xf32>
    %5 = vector.broadcast %4 : vector<1x128xf32> to vector<8x128xf32>
    %6 = arith.addf %3, %5 : vector<8x128xf32>
    %cst_5 = arith.constant 0.000000e+00 : f32
    %7 = vector.broadcast %cst_5 : f32 to vector<8x128xf32>
    %8 = arith.maximumf %6, %7 : vector<8x128xf32>
    %c0_6 = arith.constant 0 : index
    %c0_7 = arith.constant 0 : index
    %9 = vector.load %arg4[%c0_6, %c0_7] : memref<128x128xbf16, #tpu.memory_space<vmem>>, vector<128x128xbf16>
    %c0_8 = arith.constant 0 : index
    %c0_9 = arith.constant 0 : index
    %10 = vector.load %arg5[%c0_8, %c0_9] : memref<1x128xbf16, #tpu.memory_space<vmem>>, vector<1x128xbf16>
    %11 = arith.truncf %8 : vector<8x128xf32> to vector<8x128xbf16>
    %cst_10 = arith.constant dense<0.000000e+00> : vector<8x128xf32>
    %12 = tpu.matmul %11, %9, %cst_10 {dimension_numbers = #tpu.dot_dimension_numbers<[1], [0], [0], [1], [0, 0, 1, 1], [], []>} : vector<8x128xbf16>, vector<128x128xbf16>, vector<8x128xf32> -> vector<8x128xf32>
    %13 = arith.extf %10 : vector<1x128xbf16> to vector<1x128xf32>
    %14 = vector.broadcast %13 : vector<1x128xf32> to vector<8x128xf32>
    %15 = arith.addf %12, %14 : vector<8x128xf32>
    %cst_11 = arith.constant 0.000000e+00 : f32
    %16 = vector.broadcast %cst_11 : f32 to vector<8x128xf32>
    %17 = arith.maximumf %15, %16 : vector<8x128xf32>
    %c0_12 = arith.constant 0 : index
    %c0_13 = arith.constant 0 : index
    %18 = vector.load %arg6[%c0_12, %c0_13] : memref<128x128xbf16, #tpu.memory_space<vmem>>, vector<128x128xbf16>
    %c0_14 = arith.constant 0 : index
    %c0_15 = arith.constant 0 : index
    %19 = vector.load %arg7[%c0_14, %c0_15] : memref<1x128xbf16, #tpu.memory_space<vmem>>, vector<1x128xbf16>
    %20 = arith.truncf %17 : vector<8x128xf32> to vector<8x128xbf16>
    %cst_16 = arith.constant dense<0.000000e+00> : vector<8x128xf32>
    %21 = tpu.matmul %20, %18, %cst_16 {dimension_numbers = #tpu.dot_dimension_numbers<[1], [0], [0], [1], [0, 0, 1, 1], [], []>} : vector<8x128xbf16>, vector<128x128xbf16>, vector<8x128xf32> -> vector<8x128xf32>
    %22 = arith.extf %19 : vector<1x128xbf16> to vector<1x128xf32>
    %23 = vector.broadcast %22 : vector<1x128xf32> to vector<8x128xf32>
    %24 = arith.addf %21, %23 : vector<8x128xf32>
    %c0_17 = arith.constant 0 : index
    %c0_18 = arith.constant 0 : index
    %25 = vector.load %arg8[%c0_17, %c0_18] : memref<8x128xf32, #tpu.memory_space<vmem>>, vector<8x128xf32>
    tpu.vector_store %arg8[%c0_17, %c0_18], %24 {strides = array<i32>} : memref<8x128xf32, #tpu.memory_space<vmem>>, vector<8x128xf32>,
    return
  }
  func.func @transform_0(%arg0: i32) -> (i32, i32) {
    %c0_i32 = arith.constant 0 : i32
    %c0_i32_0 = arith.constant 0 : i32
    return %arg0, %c0_i32 : i32, i32
  }
  func.func @transform_1(%arg0: i32) -> (i32, i32) {
    %c0_i32 = arith.constant 0 : i32
    %c0_i32_0 = arith.constant 0 : i32
    %c0_i32_1 = arith.constant 0 : i32
    return %c0_i32, %c0_i32_0 : i32, i32
  }
  func.func @transform_2(%arg0: i32) -> (i32, i32) {
    %c0_i32 = arith.constant 0 : i32
    %c0_i32_0 = arith.constant 0 : i32
    %c0_i32_1 = arith.constant 0 : i32
    return %c0_i32, %c0_i32_0 : i32, i32
  }
  func.func @transform_3(%arg0: i32) -> (i32, i32) {
    %c0_i32 = arith.constant 0 : i32
    %c0_i32_0 = arith.constant 0 : i32
    %c0_i32_1 = arith.constant 0 : i32
    return %c0_i32, %c0_i32_0 : i32, i32
  }
  func.func @transform_4(%arg0: i32) -> (i32, i32) {
    %c0_i32 = arith.constant 0 : i32
    %c0_i32_0 = arith.constant 0 : i32
    %c0_i32_1 = arith.constant 0 : i32
    return %c0_i32, %c0_i32_0 : i32, i32
  }
  func.func @transform_5(%arg0: i32) -> (i32, i32) {
    %c0_i32 = arith.constant 0 : i32
    %c0_i32_0 = arith.constant 0 : i32
    %c0_i32_1 = arith.constant 0 : i32
    return %c0_i32, %c0_i32_0 : i32, i32
  }
  func.func @transform_6(%arg0: i32) -> (i32, i32) {
    %c0_i32 = arith.constant 0 : i32
    %c0_i32_0 = arith.constant 0 : i32
    %c0_i32_1 = arith.constant 0 : i32
    return %c0_i32, %c0_i32_0 : i32, i32
  }
  func.func @transform_7(%arg0: i32) -> (i32, i32) {
    %c0_i32 = arith.constant 0 : i32
    %c0_i32_0 = arith.constant 0 : i32
    return %arg0, %c0_i32 : i32, i32
  }
}

</mosaic_0001>

<bundles_post_ra>
// kernel: fully_connected_forward.1
= control target key start
LH: loop header
LB: loop body
LE: loop exit
PB: predicated region body
PF: predicated region fallthrough
CT: control target
= control target key end

     0   :  { %12 = vsyncpa [#allocation3], 0  ;;  %s766_s0 = inlined_call_operand.vmem [shape: bf16[8,128], index: 0, kind: input, shape index: {}]   ;;  %s767_s1 = inlined_call_operand.hbm [shape: bf16[128,128], index: 1, kind: input, shape index: {}]   ;;  %s768_s2 = inlined_call_operand.vmem [shape: bf16[1,128], index: 2, kind: input, shape index: {}]   ;;  %s769_s3 = inlined_call_operand.hbm [shape: bf16[128,128], index: 3, kind: input, shape index: {}]   ;;  %s770_s4 = inlined_call_operand.vmem [shape: bf16[1,128], index: 4, kind: input, shape index: {}]   ;;  %s771_s5 = inlined_call_operand.hbm [shape: bf16[128,128], index: 5, kind: input, shape index: {}]   ;;  %s772_s6 = inlined_call_operand.vmem [shape: bf16[1,128], index: 6, kind: input, shape index: {}]   ;;  %s773_s7 = inlined_call_operand.vmem [shape: f32[8,128], index: 7, kind: output, shape index: {}]  }
   0x1   :  { %13 = vsyncpa [#allocation5], 0  ;;  %s622_s24 = smov [#allocation4]   ;;  %s623_s26 = smov [#allocation2]  }
   0x2   :  { %s35_s25 = sshll.u32 %s622_s24, 4  ;;  %s21_s27 = sshll.u32 %s623_s26, 4  ;;  %s36_s25 = int_to_ptr.vmem [resolvable:$true] %s35_s25  ;;  %s669_s27 = int_to_ptr.vmem [resolvable:$true] %s21_s27 }
   0x3   :  { %s552_s30 = scalar_lea.hbm %s769_s3, 1024 }
   0x4   :  { %p553_p0 = scmp.ne.s32.totalorder %s769_s3, %s552_s30  ;;  %p556_p1 = scmp.lt.u32.totalorder %s552_s30, %s769_s3 }
   0x6   :  { %p558_p2 = pnand %p556_p1, %p553_p0 }
   0x8   :  { %561 = shalt.err (!%p558_p2)
}
   0x9   :  { %s562_s12 = scalar_lea.vmem %s36_s25, 1024  ;;  %p567_p4 = scmp.lt.s32.totalorder %s36_s25, %s36_s25 }
   0xa   :  { %p563_p3 = scmp.ne.s32.totalorder %s36_s25, %s562_s12  ;;  %p568_p5 = scmp.lt.s32.totalorder %s562_s12, %s562_s12 }
   0xc   :  { %p569_p6 = por %p568_p5, %p567_p4 }
   0xe   :  { %p570_p7 = pnand %p569_p6, %p563_p3 }
  0x10   :  { %573 = shalt.err (!%p570_p7)
}
  0x11   :  { %s624_s13 = smov 64   ;;  %s625_s14 = smov 4  }
  0x12   :  { %41 = dma.hbm_to_vmem [thread:$0]  %s769_s3, 1024, %s36_s25, [#allocation5], %s624_s13, %s624_s13, %s625_s14  }
  0x13   :  { %s574_s19 = scalar_lea.hbm %s767_s1, 1024 }
  0x14   :  { %p575_p8 = scmp.ne.s32.totalorder %s767_s1, %s574_s19  ;;  %p578_p9 = scmp.lt.u32.totalorder %s574_s19, %s767_s1 }
  0x16   :  { %p580_p10 = pnand %p578_p9, %p575_p8 }
  0x18   :  { %583 = shalt.err (!%p580_p10)
}
  0x19   :  { %s584_s24 = scalar_lea.vmem %s669_s27, 1024  ;;  %p589_p12 = scmp.lt.s32.totalorder %s669_s27, %s669_s27 }
  0x1a   :  { %p585_p11 = scmp.ne.s32.totalorder %s669_s27, %s584_s24  ;;  %p590_p13 = scmp.lt.s32.totalorder %s584_s24, %s584_s24 }
  0x1c   :  { %p591_p0 = por %p590_p13, %p589_p12 }
  0x1e   :  { %p592_p1 = pnand %p591_p0, %p585_p11 }
  0x20   :  { %595 = shalt.err (!%p592_p1)
}
  0x21   :  { %27 = dma.hbm_to_vmem [thread:$0]  %s767_s1, 1024, %s669_s27, [#allocation3], %s624_s13, %s624_s13, %s625_s14  }
  0x22   :  { %s626_s26 = smov [#allocation6]   ;;  %s596_s8 = scalar_lea.hbm %s771_s5, 1024 }
  0x23   :  { %s49_s28 = sshll.u32 %s626_s26, 4  ;;  %p597_p2 = scmp.ne.s32.totalorder %s771_s5, %s596_s8  ;;  %s50_s28 = int_to_ptr.vmem [resolvable:$true] %s49_s28 }
  0x24   :  { %p600_p3 = scmp.lt.u32.totalorder %s596_s8, %s771_s5 }
  0x26   :  { %p602_p4 = pnand %p600_p3, %p597_p2 }
  0x28   :  { %605 = shalt.err (!%p602_p4)
}
  0x29   :  { %s606_s15 = scalar_lea.vmem %s50_s28, 1024  ;;  %p611_p6 = scmp.lt.s32.totalorder %s50_s28, %s50_s28 }
  0x2a   :  { %p607_p5 = scmp.ne.s32.totalorder %s50_s28, %s606_s15  ;;  %p612_p7 = scmp.lt.s32.totalorder %s606_s15, %s606_s15 }
  0x2c   :  { %p613_p8 = por %p612_p7, %p611_p6 }
  0x2e   :  { %p614_p9 = pnand %p613_p8, %p607_p5 }
  0x30   :  { %617 = shalt.err (!%p614_p9)
}
  0x31   :  { %55 = dma.hbm_to_vmem [thread:$0]  %s771_s5, 1024, %s50_s28, [#allocation5], %s624_s13, %s624_s13, %s625_s14  }
  0x32   :  { %618 = dma.done.wait [#allocation3], 1024  }
  0x33   :  { %619 = vsyncadd [#allocation3], 4294966272 }
  0x34   :  { %620 = dma.done.wait [#allocation5], 2048  }
  0x35   :  { %621 = vsyncadd [#allocation5], 4294965248  ;;  %v627_v0 = vmov 0.0   ;;  %vm628_vm0 = vmmov 0   ;;  %v528_v1 = vld [vmem:[#allocation2] sm:$0xff]   ;;  %v529_v2 = vld [vmem:[#allocation2 + $0x8] sm:$0xff]   ;;  %v87_v24 = vlaneseq }
  0x36   :  { %461 = vmatprep.subr.bf16.mxu0 %v627_v0  ;;  %477 = vmatprep.mubr.msk.bf16.mxu0 %vm628_vm0, %v627_v0  ;;  %v530_v3 = vld [vmem:[#allocation2 + $0x10] sm:$0xff]   ;;  %v536_v4 = vld [vmem:[#allocation4] sm:$0xff]   ;;  %v531_v5 = vld [vmem:[#allocation2 + $0x18] sm:$0xff]  }
  0x37   :  { %481 = vmatprep.subr.bf16.mxu1 %v627_v0  ;;  %497 = vmatprep.mubr.msk.bf16.mxu1 %vm628_vm0, %v627_v0  ;;  %v537_v6 = vld [vmem:[#allocation4 + $0x8] sm:$0xff]   ;;  %v532_v7 = vld [vmem:[#allocation2 + $0x20] sm:$0xff]   ;;  %v538_v8 = vld [vmem:[#allocation4 + $0x10] sm:$0xff]   ;;  %v88_v25 = vshrl.u32 %v87_v24, 7 }
  0x38   :  { %462 = vmatpush3.bf16.msra.mxu0 %v528_v1  ;;  %482 = vmatpush3.bf16.msra.mxu1 %v536_v4  ;;  %v533_v9 = vld [vmem:[#allocation2 + $0x28] sm:$0xff]   ;;  %v539_v10 = vld [vmem:[#allocation4 + $0x18] sm:$0xff]   ;;  %v534_v11 = vld [vmem:[#allocation2 + $0x30] sm:$0xff]  }
  0x39   :  { %463 = vmatprep.subr.bf16.mxu0 %v627_v0  ;;  %483 = vmatprep.subr.bf16.mxu1 %v627_v0  ;;  %v540_v12 = vld [vmem:[#allocation4 + $0x20] sm:$0xff]   ;;  %v535_v13 = vld [vmem:[#allocation2 + $0x38] sm:$0xff]   ;;  %v541_v14 = vld [vmem:[#allocation4 + $0x28] sm:$0xff]   ;;  %v89_v28 = vsub.s32 0, %v88_v25 }
  0x3a   :  { %v68_v15 = vld [vmem:[%s766_s0] sm:$0xf]  ;;  %v542_v16 = vld [vmem:[#allocation4 + $0x30] sm:$0xff]   ;;  %v543_v17 = vld [vmem:[#allocation4 + $0x38] sm:$0xff]  }
  0x3b   :  { %v544_v18 = vld [vmem:[#allocation6] sm:$0xff]   ;;  %v545_v19 = vld [vmem:[#allocation6 + $0x8] sm:$0xff]   ;;  %v546_v20 = vld [vmem:[#allocation6 + $0x10] sm:$0xff]  }
  0x3c   :  { %464 = vmatpush3.bf16.msra.mxu0 %v529_v2  ;;  %484 = vmatpush3.bf16.msra.mxu1 %v537_v6  ;;  %v547_v21 = vld [vmem:[#allocation6 + $0x18] sm:$0xff]   ;;  %v548_v22 = vld [vmem:[#allocation6 + $0x20] sm:$0xff]   ;;  %v549_v23 = vld [vmem:[#allocation6 + $0x28] sm:$0xff]  }
  0x3d   :  { %465 = vmatprep.subr.bf16.mxu0 %v627_v0  ;;  %485 = vmatprep.subr.bf16.mxu1 %v627_v0  ;;  %v85_v26 = vld [vmem:[%s768_s2] sm:$0x1]  ;;  %v550_v37 = vld [vmem:[#allocation6 + $0x30] sm:$0xff]   ;;  %v551_v38 = vld [vmem:[#allocation6 + $0x38] sm:$0xff]  }
  0x3e   :  { %v86_v27 = vunpack.c.l.bf16 %v85_v26  ;;  %v196_v39 = vld [vmem:[%s770_s4] sm:$0x1] }
  0x3f   :  { %v198_v40 = vunpack.c.l.bf16 %v196_v39  ;;  %v308_v49 = vld [vmem:[%s772_s6] sm:$0x1] }
  0x40   :  { %466 = vmatpush3.bf16.msra.mxu0 %v530_v3  ;;  %486 = vmatpush3.bf16.msra.mxu1 %v538_v8  ;;  %v90_v29 = vrot.slane %v86_v27, %v89_v28  ;;  %v310_v50 = vunpack.c.l.bf16 %v308_v49 }
  0x41   :  { %467 = vmatprep.subr.bf16.mxu0 %v627_v0  ;;  %487 = vmatprep.subr.bf16.mxu1 %v627_v0  ;;  %v202_v41 = vrot.slane %v198_v40, %v89_v28 }
  0x42   :  { %v314_v51 = vrot.slane %v310_v50, %v89_v28 }
  0x44   :  { %468 = vmatpush3.bf16.msra.mxu0 %v531_v5  ;;  %488 = vmatpush3.bf16.msra.mxu1 %v539_v10 }
  0x45   :  { %469 = vmatprep.subr.bf16.mxu0 %v627_v0  ;;  %489 = vmatprep.subr.bf16.mxu1 %v627_v0 }
  0x48   :  { %470 = vmatpush3.bf16.msra.mxu0 %v532_v7  ;;  %490 = vmatpush3.bf16.msra.mxu1 %v540_v12 }
  0x49   :  { %471 = vmatprep.subr.bf16.mxu0 %v627_v0  ;;  %491 = vmatprep.subr.bf16.mxu1 %v627_v0 }
  0x4c   :  { %472 = vmatpush3.bf16.msra.mxu0 %v533_v9  ;;  %492 = vmatpush3.bf16.msra.mxu1 %v541_v14 }
  0x4d   :  { %473 = vmatprep.subr.bf16.mxu0 %v627_v0  ;;  %493 = vmatprep.subr.bf16.mxu1 %v627_v0 }
  0x50   :  { %474 = vmatpush3.bf16.msra.mxu0 %v534_v11  ;;  %494 = vmatpush3.bf16.msra.mxu1 %v542_v16 }
  0x51   :  { %475 = vmatprep.subr.bf16.mxu0 %v627_v0  ;;  %495 = vmatprep.subr.bf16.mxu1 %v627_v0 }
  0x54   :  { %476 = vmatpush3.bf16.msra.mxu0 %v535_v13  ;;  %496 = vmatpush3.bf16.msra.mxu1 %v543_v17 }
  0x55   :  { %501 = vmatprep.subr.bf16.mxu0 %v627_v0 }
  0x57   :  { %478 = vmatmul.mubr.bf16.vlgmr.msra.gmra.mrb[0].mxu0 %v68_v15 }
  0x58   :  { %517 = vmatprep.mubr.msk.bf16.mxu0 %vm628_vm0, %v627_v0  ;;  %502 = vmatpush3.bf16.msra.mxu0 %v544_v18 }
  0x59   :  { %503 = vmatprep.subr.bf16.mxu0 %v627_v0 }
  0x5c   :  { %504 = vmatpush3.bf16.msra.mxu0 %v545_v19 }
  0x5d   :  { %505 = vmatprep.subr.bf16.mxu0 %v627_v0 }
  0x60   :  { %506 = vmatpush3.bf16.msra.mxu0 %v546_v20 }
  0x61   :  { %507 = vmatprep.subr.bf16.mxu0 %v627_v0 }
  0x64   :  { %508 = vmatpush3.bf16.msra.mxu0 %v547_v21 }
  0x65   :  { %509 = vmatprep.subr.bf16.mxu0 %v627_v0 }
  0x68   :  { %510 = vmatpush3.bf16.msra.mxu0 %v548_v22 }
  0x69   :  { %511 = vmatprep.subr.bf16.mxu0 %v627_v0 }
  0x6c   :  { %512 = vmatpush3.bf16.msra.mxu0 %v549_v23 }
  0x6d   :  { %513 = vmatprep.subr.bf16.mxu0 %v627_v0 }
  0x70   :  { %514 = vmatpush3.bf16.msra.mxu0 %v550_v37 }
  0x71   :  { %515 = vmatprep.subr.bf16.mxu0 %v627_v0 }
  0x74   :  { %516 = vmatpush3.bf16.msra.mxu0 %v551_v38 }
 0x12a   :  { %v173_v30 = vpop.f32.mrb[0].mxu0 }
 0x12b   :  { %v174_v31 = vadd.f32 %v173_v30, %v90_v29  ;;  %v479_v32 = vpop.f32.mrb[1].mxu0 }
 0x12c   :  { %v176_v33 = vpop.f32.mrb[2].mxu0 }
 0x12d   :  { %v179_v34 = vmax.f32 %v174_v31, 0.0  ;;  %v480_v35 = vpop.f32.mrb[3].mxu0 }
 0x12f   :  { %v197_v36 = vpack.c.bf16 %v179_v34, %v179_v34 }
 0x131   :  { %498 = vmatmul.mubr.bf16.vlgmr.msra.gmra.mrb[0].mxu1 %v197_v36 }
 0x204   :  { %v285_v42 = vpop.f32.mrb[0].mxu1 }
 0x205   :  { %v286_v43 = vadd.f32 %v285_v42, %v202_v41  ;;  %v499_v44 = vpop.f32.mrb[1].mxu1 }
 0x206   :  { %v288_v45 = vpop.f32.mrb[2].mxu1 }
 0x207   :  { %v291_v46 = vmax.f32 %v286_v43, 0.0  ;;  %v500_v47 = vpop.f32.mrb[3].mxu1 }
 0x209   :  { %v309_v48 = vpack.c.bf16 %v291_v46, %v291_v46 }
 0x20b   :  { %518 = vmatmul.mubr.bf16.vlgmr.msra.gmra.mrb[4].mxu0 %v309_v48 }
 0x2de   :  { %v397_v52 = vpop.f32.mrb[4].mxu0 }
 0x2df   :  { %v398_v53 = vadd.f32 %v397_v52, %v314_v51  ;;  %v519_v54 = vpop.f32.mrb[5].mxu0 }
 0x2e0   :  { %v400_v55 = vpop.f32.mrb[6].mxu0 }
 0x2e1   :  { %403 = vst [vmem:[%s773_s7] sm:$0xff] %v398_v53  ;;  %v520_v56 = vpop.f32.mrb[7].mxu0 }
 0x2e2   :  { %408 = vsyncpa [#allocation3], 1 }
 0x2e3   :  { %409 = vsyncpa [#allocation5], 1 }

// kernel: fully_connected_forward.1
= control target key start
LH: loop header
LB: loop body
LE: loop exit
PB: predicated region body
PF: predicated region fallthrough
CT: control target
= control target key end

     0   :  { %12 = vsyncpa [#allocation3], 0  ;;  %s766_s0 = inlined_call_operand.vmem [shape: bf16[8,128], index: 0, kind: input, shape index: {}]   ;;  %s767_s1 = inlined_call_operand.hbm [shape: bf16[128,128], index: 1, kind: input, shape index: {}]   ;;  %s768_s2 = inlined_call_operand.vmem [shape: bf16[1,128], index: 2, kind: input, shape index: {}]   ;;  %s769_s3 = inlined_call_operand.hbm [shape: bf16[128,128], index: 3, kind: input, shape index: {}]   ;;  %s770_s4 = inlined_call_operand.vmem [shape: bf16[1,128], index: 4, kind: input, shape index: {}]   ;;  %s771_s5 = inlined_call_operand.hbm [shape: bf16[128,128], index: 5, kind: input, shape index: {}]   ;;  %s772_s6 = inlined_call_operand.vmem [shape: bf16[1,128], index: 6, kind: input, shape index: {}]   ;;  %s773_s7 = inlined_call_operand.vmem [shape: f32[8,128], index: 7, kind: output, shape index: {}]  }
   0x1   :  { %13 = vsyncpa [#allocation5], 0  ;;  %s622_s24 = smov [#allocation4]   ;;  %s623_s26 = smov [#allocation2]  }
   0x2   :  { %s35_s25 = sshll.u32 %s622_s24, 4  ;;  %s21_s27 = sshll.u32 %s623_s26, 4  ;;  %s36_s25 = int_to_ptr.vmem [resolvable:$true] %s35_s25  ;;  %s669_s27 = int_to_ptr.vmem [resolvable:$true] %s21_s27 }
   0x3   :  { %s552_s30 = scalar_lea.hbm %s769_s3, 1024 }
   0x4   :  { %p553_p0 = scmp.ne.s32.totalorder %s769_s3, %s552_s30  ;;  %p556_p1 = scmp.lt.u32.totalorder %s552_s30, %s769_s3 }
   0x6   :  { %p558_p2 = pnand %p556_p1, %p553_p0 }
   0x8   :  { %561 = shalt.err (!%p558_p2)
}
   0x9   :  { %s562_s12 = scalar_lea.vmem %s36_s25, 1024  ;;  %p567_p4 = scmp.lt.s32.totalorder %s36_s25, %s36_s25 }
   0xa   :  { %p563_p3 = scmp.ne.s32.totalorder %s36_s25, %s562_s12  ;;  %p568_p5 = scmp.lt.s32.totalorder %s562_s12, %s562_s12 }
   0xc   :  { %p569_p6 = por %p568_p5, %p567_p4 }
   0xe   :  { %p570_p7 = pnand %p569_p6, %p563_p3 }
  0x10   :  { %573 = shalt.err (!%p570_p7)
}
  0x11   :  { %s624_s13 = smov 64   ;;  %s625_s14 = smov 4  }
  0x12   :  { %41 = dma.hbm_to_vmem [thread:$0]  %s769_s3, 1024, %s36_s25, [#allocation5], %s624_s13, %s624_s13, %s625_s14  }
  0x13   :  { %s574_s19 = scalar_lea.hbm %s767_s1, 1024 }
  0x14   :  { %p575_p8 = scmp.ne.s32.totalorder %s767_s1, %s574_s19  ;;  %p578_p9 = scmp.lt.u32.totalorder %s574_s19, %s767_s1 }
  0x16   :  { %p580_p10 = pnand %p578_p9, %p575_p8 }
  0x18   :  { %583 = shalt.err (!%p580_p10)
}
  0x19   :  { %s584_s24 = scalar_lea.vmem %s669_s27, 1024  ;;  %p589_p12 = scmp.lt.s32.totalorder %s669_s27, %s669_s27 }
  0x1a   :  { %p585_p11 = scmp.ne.s32.totalorder %s669_s27, %s584_s24  ;;  %p590_p13 = scmp.lt.s32.totalorder %s584_s24, %s584_s24 }
  0x1c   :  { %p591_p0 = por %p590_p13, %p589_p12 }
  0x1e   :  { %p592_p1 = pnand %p591_p0, %p585_p11 }
  0x20   :  { %595 = shalt.err (!%p592_p1)
}
  0x21   :  { %27 = dma.hbm_to_vmem [thread:$0]  %s767_s1, 1024, %s669_s27, [#allocation3], %s624_s13, %s624_s13, %s625_s14  }
  0x22   :  { %s626_s26 = smov [#allocation6]   ;;  %s596_s8 = scalar_lea.hbm %s771_s5, 1024 }
  0x23   :  { %s49_s28 = sshll.u32 %s626_s26, 4  ;;  %p597_p2 = scmp.ne.s32.totalorder %s771_s5, %s596_s8  ;;  %s50_s28 = int_to_ptr.vmem [resolvable:$true] %s49_s28 }
  0x24   :  { %p600_p3 = scmp.lt.u32.totalorder %s596_s8, %s771_s5 }
  0x26   :  { %p602_p4 = pnand %p600_p3, %p597_p2 }
  0x28   :  { %605 = shalt.err (!%p602_p4)
}
  0x29   :  { %s606_s15 = scalar_lea.vmem %s50_s28, 1024  ;;  %p611_p6 = scmp.lt.s32.totalorder %s50_s28, %s50_s28 }
  0x2a   :  { %p607_p5 = scmp.ne.s32.totalorder %s50_s28, %s606_s15  ;;  %p612_p7 = scmp.lt.s32.totalorder %s606_s15, %s606_s15 }
  0x2c   :  { %p613_p8 = por %p612_p7, %p611_p6 }
  0x2e   :  { %p614_p9 = pnand %p613_p8, %p607_p5 }
  0x30   :  { %617 = shalt.err (!%p614_p9)
}
  0x31   :  { %55 = dma.hbm_to_vmem [thread:$0]  %s771_s5, 1024, %s50_s28, [#allocation5], %s624_s13, %s624_s13, %s625_s14  }
  0x32   :  { %618 = dma.done.wait [#allocation3], 1024  }
  0x33   :  { %619 = vsyncadd [#allocation3], 4294966272 }
  0x34   :  { %620 = dma.done.wait [#allocation5], 2048  }
  0x35   :  { %621 = vsyncadd [#allocation5], 4294965248  ;;  %v627_v0 = vmov 0.0   ;;  %vm628_vm0 = vmmov 0   ;;  %v528_v1 = vld [vmem:[#allocation2] sm:$0xff]   ;;  %v529_v2 = vld [vmem:[#allocation2 + $0x8] sm:$0xff]   ;;  %v87_v24 = vlaneseq }
  0x36   :  { %461 = vmatprep.subr.bf16.mxu0 %v627_v0  ;;  %477 = vmatprep.mubr.msk.bf16.mxu0 %vm628_vm0, %v627_v0  ;;  %v530_v3 = vld [vmem:[#allocation2 + $0x10] sm:$0xff]   ;;  %v536_v4 = vld [vmem:[#allocation4] sm:$0xff]   ;;  %v531_v5 = vld [vmem:[#allocation2 + $0x18] sm:$0xff]  }
  0x37   :  { %481 = vmatprep.subr.bf16.mxu1 %v627_v0  ;;  %497 = vmatprep.mubr.msk.bf16.mxu1 %vm628_vm0, %v627_v0  ;;  %v537_v6 = vld [vmem:[#allocation4 + $0x8] sm:$0xff]   ;;  %v532_v7 = vld [vmem:[#allocation2 + $0x20] sm:$0xff]   ;;  %v538_v8 = vld [vmem:[#allocation4 + $0x10] sm:$0xff]   ;;  %v88_v25 = vshrl.u32 %v87_v24, 7 }
  0x38   :  { %462 = vmatpush3.bf16.msra.mxu0 %v528_v1  ;;  %482 = vmatpush3.bf16.msra.mxu1 %v536_v4  ;;  %v533_v9 = vld [vmem:[#allocation2 + $0x28] sm:$0xff]   ;;  %v539_v10 = vld [vmem:[#allocation4 + $0x18] sm:$0xff]   ;;  %v534_v11 = vld [vmem:[#allocation2 + $0x30] sm:$0xff]  }
  0x39   :  { %463 = vmatprep.subr.bf16.mxu0 %v627_v0  ;;  %483 = vmatprep.subr.bf16.mxu1 %v627_v0  ;;  %v540_v12 = vld [vmem:[#allocation4 + $0x20] sm:$0xff]   ;;  %v535_v13 = vld [vmem:[#allocation2 + $0x38] sm:$0xff]   ;;  %v541_v14 = vld [vmem:[#allocation4 + $0x28] sm:$0xff]   ;;  %v89_v28 = vsub.s32 0, %v88_v25 }
  0x3a   :  { %v68_v15 = vld [vmem:[%s766_s0] sm:$0xf]  ;;  %v542_v16 = vld [vmem:[#allocation4 + $0x30] sm:$0xff]   ;;  %v543_v17 = vld [vmem:[#allocation4 + $0x38] sm:$0xff]  }
  0x3b   :  { %v544_v18 = vld [vmem:[#allocation6] sm:$0xff]   ;;  %v545_v19 = vld [vmem:[#allocation6 + $0x8] sm:$0xff]   ;;  %v546_v20 = vld [vmem:[#allocation6 + $0x10] sm:$0xff]  }
  0x3c   :  { %464 = vmatpush3.bf16.msra.mxu0 %v529_v2  ;;  %484 = vmatpush3.bf16.msra.mxu1 %v537_v6  ;;  %v547_v21 = vld [vmem:[#allocation6 + $0x18] sm:$0xff]   ;;  %v548_v22 = vld [vmem:[#allocation6 + $0x20] sm:$0xff]   ;;  %v549_v23 = vld [vmem:[#allocation6 + $0x28] sm:$0xff]  }
  0x3d   :  { %465 = vmatprep.subr.bf16.mxu0 %v627_v0  ;;  %485 = vmatprep.subr.bf16.mxu1 %v627_v0  ;;  %v85_v26 = vld [vmem:[%s768_s2] sm:$0x1]  ;;  %v550_v37 = vld [vmem:[#allocation6 + $0x30] sm:$0xff]   ;;  %v551_v38 = vld [vmem:[#allocation6 + $0x38] sm:$0xff]  }
  0x3e   :  { %v86_v27 = vunpack.c.l.bf16 %v85_v26  ;;  %v196_v39 = vld [vmem:[%s770_s4] sm:$0x1] }
  0x3f   :  { %v198_v40 = vunpack.c.l.bf16 %v196_v39  ;;  %v308_v49 = vld [vmem:[%s772_s6] sm:$0x1] }
  0x40   :  { %466 = vmatpush3.bf16.msra.mxu0 %v530_v3  ;;  %486 = vmatpush3.bf16.msra.mxu1 %v538_v8  ;;  %v90_v29 = vrot.slane %v86_v27, %v89_v28  ;;  %v310_v50 = vunpack.c.l.bf16 %v308_v49 }
  0x41   :  { %467 = vmatprep.subr.bf16.mxu0 %v627_v0  ;;  %487 = vmatprep.subr.bf16.mxu1 %v627_v0  ;;  %v202_v41 = vrot.slane %v198_v40, %v89_v28 }
  0x42   :  { %v314_v51 = vrot.slane %v310_v50, %v89_v28 }
  0x44   :  { %468 = vmatpush3.bf16.msra.mxu0 %v531_v5  ;;  %488 = vmatpush3.bf16.msra.mxu1 %v539_v10 }
  0x45   :  { %469 = vmatprep.subr.bf16.mxu0 %v627_v0  ;;  %489 = vmatprep.subr.bf16.mxu1 %v627_v0 }
  0x48   :  { %470 = vmatpush3.bf16.msra.mxu0 %v532_v7  ;;  %490 = vmatpush3.bf16.msra.mxu1 %v540_v12 }
  0x49   :  { %471 = vmatprep.subr.bf16.mxu0 %v627_v0  ;;  %491 = vmatprep.subr.bf16.mxu1 %v627_v0 }
  0x4c   :  { %472 = vmatpush3.bf16.msra.mxu0 %v533_v9  ;;  %492 = vmatpush3.bf16.msra.mxu1 %v541_v14 }
  0x4d   :  { %473 = vmatprep.subr.bf16.mxu0 %v627_v0  ;;  %493 = vmatprep.subr.bf16.mxu1 %v627_v0 }
  0x50   :  { %474 = vmatpush3.bf16.msra.mxu0 %v534_v11  ;;  %494 = vmatpush3.bf16.msra.mxu1 %v542_v16 }
  0x51   :  { %475 = vmatprep.subr.bf16.mxu0 %v627_v0  ;;  %495 = vmatprep.subr.bf16.mxu1 %v627_v0 }
  0x54   :  { %476 = vmatpush3.bf16.msra.mxu0 %v535_v13  ;;  %496 = vmatpush3.bf16.msra.mxu1 %v543_v17 }
  0x55   :  { %501 = vmatprep.subr.bf16.mxu0 %v627_v0 }
  0x57   :  { %478 = vmatmul.mubr.bf16.vlgmr.msra.gmra.mrb[0].mxu0 %v68_v15 }
  0x58   :  { %517 = vmatprep.mubr.msk.bf16.mxu0 %vm628_vm0, %v627_v0  ;;  %502 = vmatpush3.bf16.msra.mxu0 %v544_v18 }
  0x59   :  { %503 = vmatprep.subr.bf16.mxu0 %v627_v0 }
  0x5c   :  { %504 = vmatpush3.bf16.msra.mxu0 %v545_v19 }
  0x5d   :  { %505 = vmatprep.subr.bf16.mxu0 %v627_v0 }
  0x60   :  { %506 = vmatpush3.bf16.msra.mxu0 %v546_v20 }
  0x61   :  { %507 = vmatprep.subr.bf16.mxu0 %v627_v0 }
  0x64   :  { %508 = vmatpush3.bf16.msra.mxu0 %v547_v21 }
  0x65   :  { %509 = vmatprep.subr.bf16.mxu0 %v627_v0 }
  0x68   :  { %510 = vmatpush3.bf16.msra.mxu0 %v548_v22 }
  0x69   :  { %511 = vmatprep.subr.bf16.mxu0 %v627_v0 }
  0x6c   :  { %512 = vmatpush3.bf16.msra.mxu0 %v549_v23 }
  0x6d   :  { %513 = vmatprep.subr.bf16.mxu0 %v627_v0 }
  0x70   :  { %514 = vmatpush3.bf16.msra.mxu0 %v550_v37 }
  0x71   :  { %515 = vmatprep.subr.bf16.mxu0 %v627_v0 }
  0x74   :  { %516 = vmatpush3.bf16.msra.mxu0 %v551_v38 }
 0x12a   :  { %v173_v30 = vpop.f32.mrb[0].mxu0 }
 0x12b   :  { %v174_v31 = vadd.f32 %v173_v30, %v90_v29  ;;  %v479_v32 = vpop.f32.mrb[1].mxu0 }
 0x12c   :  { %v176_v33 = vpop.f32.mrb[2].mxu0 }
 0x12d   :  { %v179_v34 = vmax.f32 %v174_v31, 0.0  ;;  %v480_v35 = vpop.f32.mrb[3].mxu0 }
 0x12f   :  { %v197_v36 = vpack.c.bf16 %v179_v34, %v179_v34 }
 0x131   :  { %498 = vmatmul.mubr.bf16.vlgmr.msra.gmra.mrb[0].mxu1 %v197_v36 }
 0x204   :  { %v285_v42 = vpop.f32.mrb[0].mxu1 }
 0x205   :  { %v286_v43 = vadd.f32 %v285_v42, %v202_v41  ;;  %v499_v44 = vpop.f32.mrb[1].mxu1 }
 0x206   :  { %v288_v45 = vpop.f32.mrb[2].mxu1 }
 0x207   :  { %v291_v46 = vmax.f32 %v286_v43, 0.0  ;;  %v500_v47 = vpop.f32.mrb[3].mxu1 }
 0x209   :  { %v309_v48 = vpack.c.bf16 %v291_v46, %v291_v46 }
 0x20b   :  { %518 = vmatmul.mubr.bf16.vlgmr.msra.gmra.mrb[4].mxu0 %v309_v48 }
 0x2de   :  { %v397_v52 = vpop.f32.mrb[4].mxu0 }
 0x2df   :  { %v398_v53 = vadd.f32 %v397_v52, %v314_v51  ;;  %v519_v54 = vpop.f32.mrb[5].mxu0 }
 0x2e0   :  { %v400_v55 = vpop.f32.mrb[6].mxu0 }
 0x2e1   :  { %403 = vst [vmem:[%s773_s7] sm:$0xff] %v398_v53  ;;  %v520_v56 = vpop.f32.mrb[7].mxu0 }
 0x2e2   :  { %408 = vsyncpa [#allocation3], 1 }
 0x2e3   :  { %409 = vsyncpa [#allocation5], 1 }

</bundles_post_ra>
